<compile_context>
chip_gen: v6e
topology: v6e:2x2x1
jax: 0.10.0
libtpu: 0.0.40
codegen_flags: <defaults>
</compile_context>

<pallas_src>
import jax
import jax.numpy as jnp
import numpy as np
from jax import lax
from jax.experimental import pallas as pl
from jax.experimental.pallas import tpu as pltpu

XIC_KEY = "XIC"

# Inputs below this size go to a fused XLA gather: the Pallas launch fixed cost
# dwarfs moving a few KiB (production shape C=2, T=8, L=128 is ~8 KiB).
_SMALL_INPUT_BYTES = 256 * 1024
# Per-block HBM<->VMEM staging target (per buffer).  4 MiB keeps
# 2 specs x 2 (double-buffer) x block + f32 temporaries well under the VMEM budget
# on every generation, while giving >= multi-KiB contiguous HBM runs.
_TARGET_CHUNK_BYTES = 4 * 1024 * 1024
# Hard cap on a single block (only hit by the full-L fallback for odd L).
_MAX_BLOCK_BYTES = 8 * 1024 * 1024


def _permute_kernel(idx_ref, x_ref, o_ref):
    """Permute the transition-pair (T) axis of one (C, T, L_chunk) VMEM block.

    idx_ref : (T, 1) int32 in VMEM; idx_ref[t, 0] = source row of output row t.
    x_ref   : (C, T, L_chunk) input block.
    o_ref   : (C, T, L_chunk) output block (same L-chunk as the input block).

    The permute is a one-hot (T, T) matmul on the MXU: out[c] = P @ x[c].
    One-hot rows make it exact for finite values (1.0*x + 0.0*y == x); the MXU is
    idle in this HBM-bound kernel, so the matmul rides for free and avoids
    sublane-granular dynamic row indexing.
    """
    C, T, _ = x_ref.shape
    idx_col = idx_ref[...]                                # (T, 1) int32
    col = lax.broadcasted_iota(jnp.int32, (T, T), 1)      # col[t, s] = s
    p = (col == idx_col).astype(x_ref.dtype)              # P[t, s] = 1 iff s == idx[t]
    for c in range(C):                                    # static loop, C is tiny (2)
        oc = jnp.dot(p, x_ref[c], preferred_element_type=jnp.float32)
        o_ref[c, :, :] = oc.astype(o_ref.dtype)


def _pallas_permute(xic, idx, *, target_chunk_bytes=_TARGET_CHUNK_BYTES):
    """xic[:, idx, :] via bulk HBM<->VMEM staging + on-chip one-hot-matmul permute."""
    C, T, L = xic.shape
    itemsize = jnp.dtype(xic.dtype).itemsize
    col_bytes = C * T * itemsize                          # bytes per single lane column

    if L % 128 == 0:
        l_chunk = (target_chunk_bytes // max(col_bytes, 1)) // 128 * 128
        l_chunk = int(max(128, min(L, l_chunk)))
    else:
        # Last block dim must be a multiple of 128 or the full dim; use the full dim.
        l_chunk = L

    block_bytes = C * T * l_chunk * itemsize
    if block_bytes > _MAX_BLOCK_BYTES:
        # TODO(synk): also tile the T axis (scattered reads / contiguous chunked
        # writes) for tensors whose single L-column exceeds the VMEM budget.
        return xic[:, idx, :]

    num_chunks = pl.cdiv(L, l_chunk)
    idx2 = jnp.asarray(idx, dtype=jnp.int32).reshape(T, 1)

    # 2 specs x double-buffer x block + temporaries; raised above v5e's 16-MiB
    # scoped default, kept well under v7x's 64-MiB physical VMEM.
    vmem_limit = int(min(48 << 20, max(32 << 20, 4 * block_bytes + (8 << 20))))

    return pl.pallas_call(
        _permute_kernel,
        out_shape=jax.ShapeDtypeStruct((C, T, L), xic.dtype),
        grid_spec=pltpu.PrefetchScalarGridSpec(
            num_scalar_prefetch=0,
            grid=(num_chunks,),
            in_specs=[
                pl.BlockSpec((T, 1), lambda i: (0, 0)),              # idx (tiny, resident)
                pl.BlockSpec((C, T, l_chunk), lambda i: (0, 0, i)),  # contiguous L-chunk
            ],
            out_specs=pl.BlockSpec((C, T, l_chunk), lambda i: (0, 0, i)),
        ),
        compiler_params=pltpu.CompilerParams(
            # "parallel" lets v7x shard L-chunks over its 2 TensorCores; harmless on
            # single-TC v5e/v6e.
            dimension_semantics=("parallel",),
            vmem_limit_bytes=vmem_limit,
        ),
    )(idx2, xic)


def transition_shuffle_xic(xic, idx):
    """Return xic[:, idx, :] with a size-based dispatch.

    Tiny or non-float inputs -> fused XLA gather (beats any Pallas launch at the
    production shape); larger float inputs -> Pallas bulk-staged permute.
    """
    total_bytes = xic.size * jnp.dtype(xic.dtype).itemsize
    if total_bytes < _SMALL_INPUT_BYTES or not jnp.issubdtype(xic.dtype, jnp.floating):
        return xic[:, jnp.asarray(idx), :]
    return _pallas_permute(xic, idx)


def transition_shuffle_forward(sample, rng, p=0.5):
    """JAX equivalent of TransitionShuffle.forward.

    sample : dict with 'replicate_id' (python int) and XIC_KEY -> (C, T, L) array.
    rng    : numpy.random.Generator driving the host-side stochastic gate and the
             permutation draw (mirrors torch.rand / np.random.permutation in the
             original module; no device->host sync on the coin flip).
    """
    if sample["replicate_id"] == 0:
        return sample
    if rng.random() > p:  # host RNG coin, matches `torch.rand(1) > self.p`
        return sample

    xic = sample[XIC_KEY]  # (C, T, L)
    num_transition_pairs = xic.shape[1]
    if num_transition_pairs < 2:
        return sample

    idx = jnp.asarray(rng.permutation(num_transition_pairs), dtype=jnp.int32)

    out = dict(sample)
    out[XIC_KEY] = transition_shuffle_xic(xic, idx)
    return out


if __name__ == "__main__":
    key = jax.random.PRNGKey(0)
    k1, k2, k3 = jax.random.split(key, 3)

    # ---- 1) Pallas kernel, full-resident single chunk (grid=(1,)) -------------------
    C, T, L = 2, 64, 1024  # 512 KiB f32: above the XLA-dispatch threshold
    xic = jax.random.normal(k1, (C, T, L), dtype=jnp.float32)
    host_rng = np.random.default_rng(0)
    idx = jnp.asarray(host_rng.permutation(T), dtype=jnp.int32)

    ref = xic[:, idx, :]

    y = _pallas_permute(xic, idx)
    jax.block_until_ready(y)
    assert jnp.array_equal(y, ref), "pallas permute mismatch (full-resident)"

    # Dispatcher also picks the Pallas path at this size.
    y_d = transition_shuffle_xic(xic, idx)
    assert jnp.array_equal(jax.block_until_ready(y_d), ref), "dispatcher mismatch"

    # ---- 2) Pallas kernel, multi-chunk grid (exercises L tiling / pipelining) -------
    y_chunked = _pallas_permute(xic, idx, target_chunk_bytes=64 * 1024)  # l_chunk=128 -> 8 steps
    assert jnp.array_equal(jax.block_until_ready(y_chunked), ref), \
        "pallas permute mismatch (chunked)"

    # ---- 3) bf16 exactness through the one-hot MXU matmul ----------------------------
    xic_bf16 = jax.random.normal(k2, (C, T, L), dtype=jnp.float32).astype(jnp.bfloat16)
    y_bf16 = _pallas_permute(xic_bf16, idx)
    assert jnp.array_equal(jax.block_until_ready(y_bf16), xic_bf16[:, idx, :]), \
        "pallas permute mismatch (bf16)"

    # ---- 4) full forward semantics at the tiny production shape ---------------------
    #         (dispatches to the fused XLA gather, as recommended)
    xic_small = jax.random.normal(k3, (2, 8, 128), dtype=jnp.float32)
    sample = {"replicate_id": 1, XIC_KEY: xic_small, "quality": 1, "ratio": 0.5}
    out = transition_shuffle_forward(sample, np.random.default_rng(1), p=1.0)
    jax.block_until_ready(out[XIC_KEY])
    assert out[XIC_KEY].shape == xic_small.shape
    assert out["quality"] == sample["quality"] and out["ratio"] == sample["ratio"]
    # Shuffle is a permutation: per-channel row sums are preserved (order-insensitive).
    assert jnp.allclose(
        jnp.sort(out[XIC_KEY].sum(axis=-1), axis=-1),
        jnp.sort(xic_small.sum(axis=-1), axis=-1),
        atol=1e-5,
    )

    # ---- 5) replicate_id == 0 -> identity passthrough (no kernel launch) ------------
    out0 = transition_shuffle_forward(
        {"replicate_id": 0, XIC_KEY: xic_small}, np.random.default_rng(2), p=1.0
    )
    assert out0[XIC_KEY] is xic_small

    print("KERNEL_OK")
</pallas_src>

<mosaic_0001>
module attributes {stable_mosaic.version = 11 : i64} {
  func.func @_permute_kernel(%arg0: i32, %arg1: memref<64x1xi32, #tpu.memory_space<vmem>>, %arg2: memref<2x64x1024xf32, #tpu.memory_space<vmem>>, %arg3: memref<2x64x1024xf32, #tpu.memory_space<vmem>>) attributes {dimension_semantics = [#tpu.dimension_semantics<parallel>], iteration_bounds = array<i64: 1>, scalar_prefetch = 0 : i64, scratch_operands = 0 : i64, tpu.core_type = #tpu.core_type<tc>, window_params = [{pipeline_mode = #tpu.pipeline_mode<synchronous>, transform_indices = @transform_0, window_bounds = array<i64: 64, 1>}, {transform_indices = @transform_1, window_bounds = array<i64: 2, 64, 1024>}, {transform_indices = @transform_2, window_bounds = array<i64: 2, 64, 1024>}]} {
    %c0 = arith.constant 0 : index
    %c0_0 = arith.constant 0 : index
    %0 = vector.load %arg1[%c0, %c0_0] : memref<64x1xi32, #tpu.memory_space<vmem>>, vector<64x1xi32>
    %1 = tpu.iota {dimensions = array<i32: 1>} : vector<64x64xi32>
    %2 = vector.broadcast %0 : vector<64x1xi32> to vector<64x64xi32>
    %3 = arith.cmpi eq, %1, %2 : vector<64x64xi32>
    %4 = arith.extui %3 : vector<64x64xi1> to vector<64x64xi32>
    %5 = arith.sitofp %4 : vector<64x64xi32> to vector<64x64xf32>
    %c0_1 = arith.constant 0 : index
    %c0_2 = arith.constant 0 : index
    %c0_3 = arith.constant 0 : index
    %6 = vector.load %arg2[%c0_1, %c0_2, %c0_3] : memref<2x64x1024xf32, #tpu.memory_space<vmem>>, vector<1x64x1024xf32>
    %7 = vector.shape_cast %6 : vector<1x64x1024xf32> to vector<64x1024xf32>
    %cst = arith.constant dense<0.000000e+00> : vector<64x1024xf32>
    %8 = tpu.matmul %5, %7, %cst {dimension_numbers = #tpu.dot_dimension_numbers<[1], [0], [0], [1], [0, 0, 1, 1], [], []>} : vector<64x64xf32>, vector<64x1024xf32>, vector<64x1024xf32> -> vector<64x1024xf32>
    %c0_4 = arith.constant 0 : index
    %c0_5 = arith.constant 0 : index
    %c0_6 = arith.constant 0 : index
    %9 = vector.load %arg3[%c0_4, %c0_5, %c0_6] : memref<2x64x1024xf32, #tpu.memory_space<vmem>>, vector<1x64x1024xf32>
    %10 = vector.shape_cast %9 : vector<1x64x1024xf32> to vector<64x1024xf32>
    %11 = vector.shape_cast %8 : vector<64x1024xf32> to vector<1x64x1024xf32>
    tpu.vector_store %arg3[%c0_4, %c0_5, %c0_6], %11 {strides = array<i32>} : memref<2x64x1024xf32, #tpu.memory_space<vmem>>, vector<1x64x1024xf32>,
    %c1 = arith.constant 1 : index
    %c0_7 = arith.constant 0 : index
    %c0_8 = arith.constant 0 : index
    %12 = vector.load %arg2[%c1, %c0_7, %c0_8] : memref<2x64x1024xf32, #tpu.memory_space<vmem>>, vector<1x64x1024xf32>
    %13 = vector.shape_cast %12 : vector<1x64x1024xf32> to vector<64x1024xf32>
    %cst_9 = arith.constant dense<0.000000e+00> : vector<64x1024xf32>
    %14 = tpu.matmul %5, %13, %cst_9 {dimension_numbers = #tpu.dot_dimension_numbers<[1], [0], [0], [1], [0, 0, 1, 1], [], []>} : vector<64x64xf32>, vector<64x1024xf32>, vector<64x1024xf32> -> vector<64x1024xf32>
    %c1_10 = arith.constant 1 : index
    %c0_11 = arith.constant 0 : index
    %c0_12 = arith.constant 0 : index
    %15 = vector.load %arg3[%c1_10, %c0_11, %c0_12] : memref<2x64x1024xf32, #tpu.memory_space<vmem>>, vector<1x64x1024xf32>
    %16 = vector.shape_cast %15 : vector<1x64x1024xf32> to vector<64x1024xf32>
    %17 = vector.shape_cast %14 : vector<64x1024xf32> to vector<1x64x1024xf32>
    tpu.vector_store %arg3[%c1_10, %c0_11, %c0_12], %17 {strides = array<i32>} : memref<2x64x1024xf32, #tpu.memory_space<vmem>>, vector<1x64x1024xf32>,
    return
  }
  func.func @transform_0(%arg0: i32) -> (i32, i32) {
    %c0_i32 = arith.constant 0 : i32
    %c0_i32_0 = arith.constant 0 : i32
    %c0_i32_1 = arith.constant 0 : i32
    return %c0_i32, %c0_i32_0 : i32, i32
  }
  func.func @transform_1(%arg0: i32) -> (i32, i32, i32) {
    %c0_i32 = arith.constant 0 : i32
    %c0_i32_0 = arith.constant 0 : i32
    %c0_i32_1 = arith.constant 0 : i32
    return %c0_i32, %c0_i32_0, %arg0 : i32, i32, i32
  }
  func.func @transform_2(%arg0: i32) -> (i32, i32, i32) {
    %c0_i32 = arith.constant 0 : i32
    %c0_i32_0 = arith.constant 0 : i32
    %c0_i32_1 = arith.constant 0 : i32
    return %c0_i32, %c0_i32_0, %arg0 : i32, i32, i32
  }
}

</mosaic_0001>

<bundles_post_ra>
// kernel: tpu_custom_call.1
= control target key start
LH: loop header
LB: loop body
LE: loop exit
PB: predicated region body
PF: predicated region fallthrough
CT: control target
= control target key end

     0   :  { %7 = vsyncpa [#allocation3], 0  ;;  %s1695_s0 = inlined_call_operand.vmem [shape: s32[64,1], index: 0, kind: input, shape index: {}]   ;;  %s1696_s1 = inlined_call_operand.hbm [shape: f32[2,64,1024], index: 1, kind: input, shape index: {}]   ;;  %s1697_s2 = inlined_call_operand.hbm [shape: f32[2,64,1024], index: 2, kind: output, shape index: {}]  }
   0x1   :  { %8 = vsyncpa [#allocation4], 0  ;;  %s1412_s9 = smov [#allocation2]  }
   0x2   :  { %s16_s10 = sshll.u32 %s1412_s9, 4  ;;  %s17_s10 = int_to_ptr.vmem [resolvable:$true] %s16_s10 }
   0x3   :  { %s1376_s11 = scalar_lea.vmem %s17_s10, 16384  ;;  %p1381_p1 = scmp.lt.s32.totalorder %s17_s10, %s17_s10 }
   0x4   :  { %p1377_p0 = scmp.ne.s32.totalorder %s17_s10, %s1376_s11  ;;  %p1382_p2 = scmp.lt.s32.totalorder %s1376_s11, %s1376_s11 }
   0x6   :  { %p1383_p3 = por %p1382_p2, %p1381_p1 }
   0x8   :  { %p1384_p4 = pnand %p1383_p3, %p1377_p0 }
   0xa   :  { %1387 = shalt.err (!%p1384_p4)
}
   0xb   :  { %s1413_s12 = smov 1024   ;;  %s1414_s13 = smov 64  }
   0xc   :  { %22 = dma.hbm_to_vmem [thread:$0]  %s1696_s1, 16384, %s17_s10, [#allocation3], %s1413_s12, %s1413_s12, %s1414_s13  }
   0xd   :  { %1408 = dma.done.wait [#allocation3], 16384  }
   0xe   :  { %1409 = vsyncadd [#allocation3], 4294950912  ;;  %v1415_v0 = vmov 0   ;;  %v1416_v1 = vmov 0.0   ;;  %v28_v2 = vld [vmem:[%s1695_s0 + $0x10] sm:$0xff]  ;;  %v26_v3 = vld [vmem:[%s1695_s0] sm:$0xff]  ;;  %v34_v44 = vlaneseq }
   0xf   :  { %1367 = vset.pattern.permute.xlu1 %v1415_v0  ;;  %1366 = vset.pattern.permute.xlu0 %v1415_v0  ;;  %v29_v4 = vld [vmem:[%s1695_s0 + $0x18] sm:$0xff]  ;;  %v27_v5 = vld [vmem:[%s1695_s0 + $0x8] sm:$0xff]  ;;  %v140_v8 = vld [vmem:[#allocation2 + $0x1c0] sm:$0xff]  ;;  %vm148_vm0 = vcmask 523264  }
  0x10   :  { %237 = vmatprep.mubr.f32.mxu0 %v1416_v1  ;;  %350 = vmatprep.mubr.f32.mxu1 %v1416_v1  ;;  %v141_v6 = vld [vmem:[#allocation2 + $0x1c8] sm:$0xff]  ;;  %v143_v7 = vld [vmem:[#allocation2 + $0x1d8] sm:$0xff]  ;;  %v142_v9 = vld [vmem:[#allocation2 + $0x1d0] sm:$0xff]  ;;  %v1465_v45 = vand.u32 127, %v34_v44 }
  0x11   :  { %43 = vperm.xlu1 %1367, %v28_v2   ;;  %37 = vperm.xlu0 %1366, %v26_v3   ;;  %v133_v10 = vld [vmem:[#allocation2 + $0x188] sm:$0xff]  ;;  %v135_v11 = vld [vmem:[#allocation2 + $0x198] sm:$0xff]  ;;  %v132_v12 = vld [vmem:[#allocation2 + $0x180] sm:$0xff] }
  0x12   :  { %189 = vmatprep.subr.mxu0 %v141_v6  ;;  %302 = vmatprep.subr.mxu1 %v143_v7  ;;  %v134_v13 = vld [vmem:[#allocation2 + $0x190] sm:$0xff]  ;;  %v125_v14 = vld [vmem:[#allocation2 + $0x148] sm:$0xff]  ;;  %v30_v16 = vld [vmem:[%s1695_s0 + $0x20] sm:$0xff] }
  0x13   :  { %190 = vmatpush1.msra.mxu0 %v140_v8  ;;  %v31_v15 = vld [vmem:[%s1695_s0 + $0x28] sm:$0xff]  ;;  %303 = vmatpush1.msra.mxu1 %v142_v9  ;;  %v127_v17 = vld [vmem:[#allocation2 + $0x158] sm:$0xff]  ;;  %v124_v18 = vld [vmem:[#allocation2 + $0x140] sm:$0xff] }
  0x14   :  { %191 = vmatprep.subr.mxu0 %v133_v10  ;;  %304 = vmatprep.subr.mxu1 %v135_v11  ;;  %v126_v19 = vld [vmem:[#allocation2 + $0x150] sm:$0xff]  ;;  %v117_v20 = vld [vmem:[#allocation2 + $0x108] sm:$0xff]  ;;  %v119_v21 = vld [vmem:[#allocation2 + $0x118] sm:$0xff] }
  0x15   :  { %46 = vperm.xlu1 %1367, %v29_v4   ;;  %40 = vperm.xlu0 %1366, %v27_v5   ;;  %v116_v22 = vld [vmem:[#allocation2 + $0x100] sm:$0xff]  ;;  %v33_v23 = vld [vmem:[%s1695_s0 + $0x38] sm:$0xff]  ;;  %v32_v24 = vld [vmem:[%s1695_s0 + $0x30] sm:$0xff]  ;;  %s1417_s0 = smov [#allocation5]  }
  0x16   :  { %192 = vmatpush1.msra.mxu0 %v132_v12  ;;  %305 = vmatpush1.msra.mxu1 %v134_v13  ;;  %v118_v25 = vld [vmem:[#allocation2 + $0x110] sm:$0xff]  ;;  %v109_v26 = vld [vmem:[#allocation2 + $0xc8] sm:$0xff]  ;;  %v111_v27 = vld [vmem:[#allocation2 + $0xd8] sm:$0xff]  ;;  %s1276_s3 = sshll.u32 %s1417_s0, 4  ;;  %s1277_s3 = int_to_ptr.vmem [resolvable:$true] %s1276_s3 }
  0x17   :  { %193 = vmatprep.subr.mxu0 %v125_v14  ;;  %306 = vmatprep.subr.mxu1 %v127_v17  ;;  %v108_v28 = vld [vmem:[#allocation2 + $0xc0] sm:$0xff]  ;;  %v110_v29 = vld [vmem:[#allocation2 + $0xd0] sm:$0xff]  ;;  %v101_v30 = vld [vmem:[#allocation2 + $0x88] sm:$0xff]  ;;  %s1388_s4 = scalar_lea.vmem %s1277_s3, 16384  ;;  %p1393_p6 = scmp.lt.s32.totalorder %s1277_s3, %s1277_s3 }
  0x18   :  { %194 = vmatpush1.msra.mxu0 %v124_v18  ;;  %307 = vmatpush1.msra.mxu1 %v126_v19  ;;  %v103_v31 = vld [vmem:[#allocation2 + $0x98] sm:$0xff]  ;;  %v100_v32 = vld [vmem:[#allocation2 + $0x80] sm:$0xff]  ;;  %v102_v33 = vld [vmem:[#allocation2 + $0x90] sm:$0xff]  ;;  %p1389_p5 = scmp.ne.s32.totalorder %s1277_s3, %s1388_s4  ;;  %p1394_p7 = scmp.lt.s32.totalorder %s1388_s4, %s1388_s4 }
  0x19   :  { %52 = vperm.xlu1 %1367, %v31_v15   ;;  %49 = vperm.xlu0 %1366, %v30_v16   ;;  %v93_v34 = vld [vmem:[#allocation2 + $0x48] sm:$0xff]  ;;  %v95_v35 = vld [vmem:[#allocation2 + $0x58] sm:$0xff]  ;;  %v92_v36 = vld [vmem:[#allocation2 + $0x40] sm:$0xff] }
  0x1a   :  { %195 = vmatprep.subr.mxu0 %v117_v20  ;;  %308 = vmatprep.subr.mxu1 %v119_v21  ;;  %v94_v37 = vld [vmem:[#allocation2 + $0x50] sm:$0xff]  ;;  %v85_v38 = vld [vmem:[#allocation2 + $0x8] sm:$0xff]  ;;  %v87_v39 = vld [vmem:[#allocation2 + $0x18] sm:$0xff]  ;;  %p1395_p8 = por %p1394_p7, %p1393_p6 }
  0x1b   :  { %196 = vmatpush1.msra.mxu0 %v116_v22  ;;  %309 = vmatpush1.msra.mxu1 %v118_v25  ;;  %v84_v40 = vld [vmem:[#allocation2] sm:$0xff]  ;;  %v86_v41 = vld [vmem:[#allocation2 + $0x10] sm:$0xff]  ;;  %v145_v42 = vld [vmem:[#allocation2 + $0x1e8] sm:$0xff] }
  0x1c   :  { %197 = vmatprep.subr.mxu0 %v109_v26  ;;  %310 = vmatprep.subr.mxu1 %v111_v27  ;;  %v147_v43 = vld [vmem:[#allocation2 + $0x1f8] sm:$0xff]  ;;  %v144_v47 = vld [vmem:[#allocation2 + $0x1e0] sm:$0xff]  ;;  %v146_v48 = vld [vmem:[#allocation2 + $0x1f0] sm:$0xff]  ;;  %p1396_p9 = pnand %p1395_p8, %p1389_p5 }
  0x1d   :  { %58 = vperm.xlu1 %1367, %v33_v23   ;;  %55 = vperm.xlu0 %1366, %v32_v24   ;;  %v137_v50 = vld [vmem:[#allocation2 + $0x1a8] sm:$0xff]  ;;  %v139_v51 = vld [vmem:[#allocation2 + $0x1b8] sm:$0xff]  ;;  %v136_v54 = vld [vmem:[#allocation2 + $0x1a0] sm:$0xff] }
  0x1e   :  { %198 = vmatpush1.msra.mxu0 %v108_v28  ;;  %311 = vmatpush1.msra.mxu1 %v110_v29  ;;  %v138_v55 = vld [vmem:[#allocation2 + $0x1b0] sm:$0xff]  ;;  %v129_v57 = vld [vmem:[#allocation2 + $0x168] sm:$0xff]  ;;  %v131_v58 = vld [vmem:[#allocation2 + $0x178] sm:$0xff] }
  0x1f   :  { %199 = vmatprep.subr.mxu0 %v101_v30  ;;  %312 = vmatprep.subr.mxu1 %v103_v31  ;;  %v128_v60 = vld [vmem:[#allocation2 + $0x160] sm:$0xff]  ;;  %v130_v61 = vld [vmem:[#allocation2 + $0x170] sm:$0xff]  ;;  %v121_v63 = vld [vmem:[#allocation2 + $0x128] sm:$0xff] }
  0x20   :  { %200 = vmatpush1.msra.mxu0 %v100_v32  ;;  %313 = vmatpush1.msra.mxu1 %v102_v33  ;;  %v123_v0 = vld [vmem:[#allocation2 + $0x138] sm:$0xff]  ;;  %v120_v3 = vld [vmem:[#allocation2 + $0x120] sm:$0xff]  ;;  %v122_v4 = vld [vmem:[#allocation2 + $0x130] sm:$0xff] }
  0x21   :  { %201 = vmatprep.subr.mxu0 %v93_v34  ;;  %314 = vmatprep.subr.mxu1 %v95_v35  ;;  %v113_v6 = vld [vmem:[#allocation2 + $0xe8] sm:$0xff]  ;;  %v115_v7 = vld [vmem:[#allocation2 + $0xf8] sm:$0xff]  ;;  %v112_v9 = vld [vmem:[#allocation2 + $0xe0] sm:$0xff] }
  0x22   :  { %202 = vmatpush1.msra.mxu0 %v92_v36  ;;  %315 = vmatpush1.msra.mxu1 %v94_v37  ;;  %v114_v10 = vld [vmem:[#allocation2 + $0xf0] sm:$0xff]  ;;  %v105_v12 = vld [vmem:[#allocation2 + $0xa8] sm:$0xff]  ;;  %v107_v13 = vld [vmem:[#allocation2 + $0xb8] sm:$0xff] }
  0x23   :  { %203 = vmatprep.subr.mxu0 %v85_v38  ;;  %316 = vmatprep.subr.mxu1 %v87_v39  ;;  %v104_v15 = vld [vmem:[#allocation2 + $0xa0] sm:$0xff]  ;;  %v106_v16 = vld [vmem:[#allocation2 + $0xb0] sm:$0xff]  ;;  %v97_v18 = vld [vmem:[#allocation2 + $0x68] sm:$0xff] }
  0x24   :  { %204 = vmatpush1.msra.mxu0 %v84_v40  ;;  %317 = vmatpush1.msra.mxu1 %v86_v41  ;;  %v99_v19 = vld [vmem:[#allocation2 + $0x78] sm:$0xff]  ;;  %v96_v21 = vld [vmem:[#allocation2 + $0x60] sm:$0xff]  ;;  %v98_v22 = vld [vmem:[#allocation2 + $0x70] sm:$0xff] }
  0x25   :  { %415 = vmatprep.subr.mxu0 %v145_v42  ;;  %528 = vmatprep.subr.mxu1 %v147_v43  ;;  %v89_v24 = vld [vmem:[#allocation2 + $0x28] sm:$0xff]  ;;  %v91_v25 = vld [vmem:[#allocation2 + $0x38] sm:$0xff]  ;;  %v88_v26 = vld [vmem:[#allocation2 + $0x20] sm:$0xff] }
  0x26   :  { %v90_v27 = vld [vmem:[#allocation2 + $0x30] sm:$0xff]  ;;  %v747_v29 = vld [vmem:[#allocation2 + $0x3c8] sm:$0xff]  ;;  %v749_v30 = vld [vmem:[#allocation2 + $0x3d8] sm:$0xff] }
  0x27   :  { %v746_v31 = vld [vmem:[#allocation2 + $0x3c0] sm:$0xff]  ;;  %v748_v32 = vld [vmem:[#allocation2 + $0x3d0] sm:$0xff]  ;;  %v739_v33 = vld [vmem:[#allocation2 + $0x388] sm:$0xff] }
  0x28   :  { %v741_v34 = vld [vmem:[#allocation2 + $0x398] sm:$0xff]  ;;  %v738_v35 = vld [vmem:[#allocation2 + $0x380] sm:$0xff]  ;;  %v740_v36 = vld [vmem:[#allocation2 + $0x390] sm:$0xff] }
  0x29   :  { %v731_v37 = vld [vmem:[#allocation2 + $0x348] sm:$0xff]  ;;  %v733_v38 = vld [vmem:[#allocation2 + $0x358] sm:$0xff]  ;;  %v730_v39 = vld [vmem:[#allocation2 + $0x340] sm:$0xff] }
  0x2a   :  { %v732_v40 = vld [vmem:[#allocation2 + $0x350] sm:$0xff]  ;;  %v723_v41 = vld [vmem:[#allocation2 + $0x308] sm:$0xff]  ;;  %v725_v42 = vld [vmem:[#allocation2 + $0x318] sm:$0xff] }
  0x2b   :  { %v722_v43 = vld [vmem:[#allocation2 + $0x300] sm:$0xff]  ;;  %v724_v44 = vld [vmem:[#allocation2 + $0x310] sm:$0xff] }
  0x8c   :  { %v38_v46 = vpop.permute.xlu0 %37  ;;  %v44_v52 = vpop.permute.xlu1 %43 }
  0x8d   :  { %vm60_vm1 = vcmp.eq.s32.totalorder %v1465_v45, %v38_v46  ;;  %vm62_vm2 = vcmp.eq.s32.totalorder %v1465_v45, %v44_v52  ;;  %v717_v46 = vld [vmem:[#allocation2 + $0x2d8] sm:$0xff]  ;;  %v706_v52 = vld [vmem:[#allocation2 + $0x280] sm:$0xff] }
  0x8e   :  { %v1469_v49 = vsel %vm60_vm1, 1.0, %v1416_v1  ;;  %v1487_v59 = vsel %vm62_vm2, 1.0, %v1416_v1 }
  0x8f   :  { %1296 = vmatmul.mubr.msk.f32.vlgmr.msra.gmra.mxu0 %vm148_vm0, %v1469_v49  ;;  %1304 = vmatmul.mubr.msk.f32.vlgmr.msra.gmra.mxu1 %vm148_vm0, %v1469_v49 }
  0x90   :  { %416 = vmatpush1.msra.mxu0 %v144_v47  ;;  %529 = vmatpush1.msra.mxu1 %v146_v48  ;;  %v41_v53 = vpop.permute.xlu0 %40  ;;  %v47_v62 = vpop.permute.xlu1 %46  ;;  %v714_v47 = vld [vmem:[#allocation2 + $0x2c0] sm:$0xff]  ;;  %v716_v48 = vld [vmem:[#allocation2 + $0x2d0] sm:$0xff] }
  0x91   :  { %vm61_vm3 = vcmp.eq.s32.totalorder %v1465_v45, %v41_v53  ;;  %243 = vmatprep.mubr.f32.mxu0 %v1416_v1  ;;  %356 = vmatprep.mubr.f32.mxu1 %v1416_v1  ;;  %vm63_vm4 = vcmp.eq.s32.totalorder %v1465_v45, %v47_v62  ;;  %v708_v53 = vld [vmem:[#allocation2 + $0x290] sm:$0xff]  ;;  %v690_v62 = vld [vmem:[#allocation2 + $0x200] sm:$0xff] }
  0x92   :  { %v1480_v56 = vsel %vm61_vm3, 1.0, %v1416_v1  ;;  %417 = vmatprep.subr.mxu0 %v137_v50  ;;  %530 = vmatprep.subr.mxu1 %v139_v51  ;;  %v1499_v5 = vsel %vm63_vm4, 1.0, %v1416_v1  ;;  %v707_v50 = vld [vmem:[#allocation2 + $0x288] sm:$0xff]  ;;  %v709_v51 = vld [vmem:[#allocation2 + $0x298] sm:$0xff] }
  0x93   :  { %1297 = vmatmul.mubr.msk.f32.gmra.mxu0 %vm148_vm0, %v1480_v56  ;;  %1305 = vmatmul.mubr.msk.f32.gmra.mxu1 %vm148_vm0, %v1480_v56 }
  0x94   :  { %418 = vmatpush1.msra.mxu0 %v136_v54  ;;  %531 = vmatpush1.msra.mxu1 %v138_v55  ;;  %v50_v2 = vpop.permute.xlu0 %49  ;;  %v53_v8 = vpop.permute.xlu1 %52  ;;  %v699_v54 = vld [vmem:[#allocation2 + $0x248] sm:$0xff]  ;;  %v701_v55 = vld [vmem:[#allocation2 + $0x258] sm:$0xff] }
  0x95   :  { %249 = vmatprep.mubr.f32.mxu0 %v1416_v1  ;;  %362 = vmatprep.mubr.f32.mxu1 %v1416_v1  ;;  %vm64_vm5 = vcmp.eq.s32.totalorder %v1465_v45, %v50_v2  ;;  %vm65_vm6 = vcmp.eq.s32.totalorder %v1465_v45, %v53_v8  ;;  %v753_v2 = vld [vmem:[#allocation2 + $0x3f8] sm:$0xff]  ;;  %v742_v8 = vld [vmem:[#allocation2 + $0x3a0] sm:$0xff] }
  0x96   :  { %419 = vmatprep.subr.mxu0 %v129_v57  ;;  %532 = vmatprep.subr.mxu1 %v131_v58  ;;  %v1509_v11 = vsel %vm64_vm5, 1.0, %v1416_v1  ;;  %v1519_v17 = vsel %vm65_vm6, 1.0, %v1416_v1  ;;  %v698_v57 = vld [vmem:[#allocation2 + $0x240] sm:$0xff]  ;;  %v700_v58 = vld [vmem:[#allocation2 + $0x250] sm:$0xff] }
  0x97   :  { %1298 = vmatmul.mubr.msk.f32.gmra.mxu0 %vm148_vm0, %v1487_v59  ;;  %1306 = vmatmul.mubr.msk.f32.gmra.mxu1 %vm148_vm0, %v1487_v59 }
  0x98   :  { %420 = vmatpush1.msra.mxu0 %v128_v60  ;;  %533 = vmatpush1.msra.mxu1 %v130_v61  ;;  %v56_v14 = vpop.permute.xlu0 %55  ;;  %v59_v20 = vpop.permute.xlu1 %58  ;;  %v691_v60 = vld [vmem:[#allocation2 + $0x208] sm:$0xff]  ;;  %v693_v61 = vld [vmem:[#allocation2 + $0x218] sm:$0xff] }
  0x99   :  { %255 = vmatprep.mubr.f32.mxu0 %v1416_v1  ;;  %368 = vmatprep.mubr.f32.mxu1 %v1416_v1  ;;  %vm66_vm7 = vcmp.eq.s32.totalorder %v1465_v45, %v56_v14  ;;  %vm67_vm8 = vcmp.eq.s32.totalorder %v1465_v45, %v59_v20  ;;  %v715_v45 = vld [vmem:[#allocation2 + $0x2c8] sm:$0xff]  ;;  %v736_v14 = vld [vmem:[#allocation2 + $0x370] sm:$0xff] }
  0x9a   :  { %421 = vmatprep.subr.mxu0 %v121_v63  ;;  %534 = vmatprep.subr.mxu1 %v123_v0  ;;  %v1529_v23 = vsel %vm66_vm7, 1.0, %v1416_v1  ;;  %v1539_v28 = vsel %vm67_vm8, 1.0, %v1416_v1  ;;  %v692_v63 = vld [vmem:[#allocation2 + $0x210] sm:$0xff]  ;;  %v751_v0 = vld [vmem:[#allocation2 + $0x3e8] sm:$0xff] }
  0x9b   :  { %1299 = vmatmul.mubr.msk.f32.gmra.mxu0 %vm148_vm0, %v1499_v5  ;;  %1307 = vmatmul.mubr.msk.f32.gmra.mxu1 %vm148_vm0, %v1499_v5  ;;  %v719_v20 = vld [vmem:[#allocation2 + $0x2e8] sm:$0xff] }
  0x9c   :  { %422 = vmatpush1.msra.mxu0 %v120_v3  ;;  %535 = vmatpush1.msra.mxu1 %v122_v4  ;;  %v750_v3 = vld [vmem:[#allocation2 + $0x3e0] sm:$0xff]  ;;  %v752_v4 = vld [vmem:[#allocation2 + $0x3f0] sm:$0xff] }
  0x9d   :  { %261 = vmatprep.mubr.f32.mxu0 %v1416_v1  ;;  %374 = vmatprep.mubr.f32.mxu1 %v1416_v1 }
  0x9e   :  { %423 = vmatprep.subr.mxu0 %v113_v6  ;;  %536 = vmatprep.subr.mxu1 %v115_v7  ;;  %v743_v6 = vld [vmem:[#allocation2 + $0x3a8] sm:$0xff]  ;;  %v745_v7 = vld [vmem:[#allocation2 + $0x3b8] sm:$0xff] }
  0x9f   :  { %1300 = vmatmul.mubr.msk.f32.gmra.mxu0 %vm148_vm0, %v1509_v11  ;;  %1308 = vmatmul.mubr.msk.f32.gmra.mxu1 %vm148_vm0, %v1509_v11 }
  0xa0   :  { %424 = vmatpush1.msra.mxu0 %v112_v9  ;;  %537 = vmatpush1.msra.mxu1 %v114_v10  ;;  %v744_v9 = vld [vmem:[#allocation2 + $0x3b0] sm:$0xff]  ;;  %v735_v10 = vld [vmem:[#allocation2 + $0x368] sm:$0xff] }
  0xa1   :  { %267 = vmatprep.mubr.f32.mxu0 %v1416_v1  ;;  %380 = vmatprep.mubr.f32.mxu1 %v1416_v1 }
  0xa2   :  { %425 = vmatprep.subr.mxu0 %v105_v12  ;;  %538 = vmatprep.subr.mxu1 %v107_v13  ;;  %v737_v12 = vld [vmem:[#allocation2 + $0x378] sm:$0xff]  ;;  %v734_v13 = vld [vmem:[#allocation2 + $0x360] sm:$0xff] }
  0xa3   :  { %1301 = vmatmul.mubr.msk.f32.gmra.mxu0 %vm148_vm0, %v1519_v17  ;;  %1309 = vmatmul.mubr.msk.f32.gmra.mxu1 %vm148_vm0, %v1519_v17 }
  0xa4   :  { %426 = vmatpush1.msra.mxu0 %v104_v15  ;;  %539 = vmatpush1.msra.mxu1 %v106_v16  ;;  %v727_v15 = vld [vmem:[#allocation2 + $0x328] sm:$0xff]  ;;  %v729_v16 = vld [vmem:[#allocation2 + $0x338] sm:$0xff] }
  0xa5   :  { %273 = vmatprep.mubr.f32.mxu0 %v1416_v1  ;;  %386 = vmatprep.mubr.f32.mxu1 %v1416_v1 }
  0xa6   :  { %427 = vmatprep.subr.mxu0 %v97_v18  ;;  %540 = vmatprep.subr.mxu1 %v99_v19  ;;  %v726_v18 = vld [vmem:[#allocation2 + $0x320] sm:$0xff]  ;;  %v728_v19 = vld [vmem:[#allocation2 + $0x330] sm:$0xff] }
  0xa7   :  { %1302 = vmatmul.mubr.msk.f32.gmra.mxu0 %vm148_vm0, %v1529_v23  ;;  %1310 = vmatmul.mubr.msk.f32.gmra.mxu1 %vm148_vm0, %v1529_v23 }
  0xa8   :  { %428 = vmatpush1.msra.mxu0 %v96_v21  ;;  %541 = vmatpush1.msra.mxu1 %v98_v22  ;;  %v721_v21 = vld [vmem:[#allocation2 + $0x2f8] sm:$0xff]  ;;  %v718_v22 = vld [vmem:[#allocation2 + $0x2e0] sm:$0xff] }
  0xa9   :  { %279 = vmatprep.mubr.f32.mxu0 %v1416_v1  ;;  %392 = vmatprep.mubr.f32.mxu1 %v1416_v1 }
  0xaa   :  { %429 = vmatprep.subr.mxu0 %v89_v24  ;;  %542 = vmatprep.subr.mxu1 %v91_v25  ;;  %v720_v24 = vld [vmem:[#allocation2 + $0x2f0] sm:$0xff]  ;;  %v711_v25 = vld [vmem:[#allocation2 + $0x2a8] sm:$0xff] }
  0xab   :  { %1303 = vmatmul.mubr.msk.f32.gmra.mxu0 %vm148_vm0, %v1539_v28  ;;  %1311 = vmatmul.mubr.msk.f32.gmra.mxu1 %vm148_vm0, %v1539_v28 }
  0xac   :  { %430 = vmatpush1.msra.mxu0 %v88_v26  ;;  %543 = vmatpush1.msra.mxu1 %v90_v27  ;;  %v713_v26 = vld [vmem:[#allocation2 + $0x2b8] sm:$0xff]  ;;  %v710_v27 = vld [vmem:[#allocation2 + $0x2a0] sm:$0xff] }
  0xad   :  { %463 = vmatprep.mubr.f32.mxu0 %v1416_v1  ;;  %576 = vmatprep.mubr.f32.mxu1 %v1416_v1 }
  0xae   :  { %770 = vmatprep.subr.mxu0 %v747_v29  ;;  %883 = vmatprep.subr.mxu1 %v749_v30  ;;  %v712_v29 = vld [vmem:[#allocation2 + $0x2b0] sm:$0xff]  ;;  %v703_v30 = vld [vmem:[#allocation2 + $0x268] sm:$0xff] }
  0xaf   :  { %1312 = vmatmul.mubr.msk.f32.vlgmr.msra.gmra.mxu0 %vm148_vm0, %v1469_v49  ;;  %1320 = vmatmul.mubr.msk.f32.vlgmr.msra.gmra.mxu1 %vm148_vm0, %v1469_v49 }
  0xb0   :  { %771 = vmatpush1.msra.mxu0 %v746_v31  ;;  %884 = vmatpush1.msra.mxu1 %v748_v32  ;;  %v705_v31 = vld [vmem:[#allocation2 + $0x278] sm:$0xff]  ;;  %v702_v32 = vld [vmem:[#allocation2 + $0x260] sm:$0xff] }
  0xb1   :  { %469 = vmatprep.mubr.f32.mxu0 %v1416_v1  ;;  %582 = vmatprep.mubr.f32.mxu1 %v1416_v1 }
  0xb2   :  { %772 = vmatprep.subr.mxu0 %v739_v33  ;;  %885 = vmatprep.subr.mxu1 %v741_v34  ;;  %v704_v33 = vld [vmem:[#allocation2 + $0x270] sm:$0xff]  ;;  %v695_v34 = vld [vmem:[#allocation2 + $0x228] sm:$0xff] }
  0xb3   :  { %1313 = vmatmul.mubr.msk.f32.gmra.mxu0 %vm148_vm0, %v1480_v56  ;;  %1321 = vmatmul.mubr.msk.f32.gmra.mxu1 %vm148_vm0, %v1480_v56 }
  0xb4   :  { %773 = vmatpush1.msra.mxu0 %v738_v35  ;;  %886 = vmatpush1.msra.mxu1 %v740_v36  ;;  %v697_v35 = vld [vmem:[#allocation2 + $0x238] sm:$0xff]  ;;  %v694_v36 = vld [vmem:[#allocation2 + $0x220] sm:$0xff] }
  0xb5   :  { %475 = vmatprep.mubr.f32.mxu0 %v1416_v1  ;;  %588 = vmatprep.mubr.f32.mxu1 %v1416_v1 }
  0xb6   :  { %774 = vmatprep.subr.mxu0 %v731_v37  ;;  %887 = vmatprep.subr.mxu1 %v733_v38  ;;  %v696_v37 = vld [vmem:[#allocation2 + $0x230] sm:$0xff] }
  0xb7   :  { %1314 = vmatmul.mubr.msk.f32.gmra.mxu0 %vm148_vm0, %v1487_v59  ;;  %1322 = vmatmul.mubr.msk.f32.gmra.mxu1 %vm148_vm0, %v1487_v59 }
  0xb8   :  { %775 = vmatpush1.msra.mxu0 %v730_v39  ;;  %888 = vmatpush1.msra.mxu1 %v732_v40 }
  0xb9   :  { %481 = vmatprep.mubr.f32.mxu0 %v1416_v1  ;;  %594 = vmatprep.mubr.f32.mxu1 %v1416_v1 }
  0xba   :  { %776 = vmatprep.subr.mxu0 %v723_v41  ;;  %889 = vmatprep.subr.mxu1 %v725_v42 }
  0xbb   :  { %1315 = vmatmul.mubr.msk.f32.gmra.mxu0 %vm148_vm0, %v1499_v5  ;;  %1323 = vmatmul.mubr.msk.f32.gmra.mxu1 %vm148_vm0, %v1499_v5 }
  0xbc   :  { %777 = vmatpush1.msra.mxu0 %v722_v43  ;;  %890 = vmatpush1.msra.mxu1 %v724_v44 }
  0xbd   :  { %487 = vmatprep.mubr.f32.mxu0 %v1416_v1  ;;  %600 = vmatprep.mubr.f32.mxu1 %v1416_v1 }
  0xbe   :  { %778 = vmatprep.subr.mxu0 %v715_v45  ;;  %891 = vmatprep.subr.mxu1 %v717_v46 }
  0xbf   :  { %1316 = vmatmul.mubr.msk.f32.gmra.mxu0 %vm148_vm0, %v1509_v11  ;;  %1324 = vmatmul.mubr.msk.f32.gmra.mxu1 %vm148_vm0, %v1509_v11 }
  0xc0   :  { %779 = vmatpush1.msra.mxu0 %v714_v47  ;;  %892 = vmatpush1.msra.mxu1 %v716_v48 }
  0xc1   :  { %493 = vmatprep.mubr.f32.mxu0 %v1416_v1  ;;  %606 = vmatprep.mubr.f32.mxu1 %v1416_v1 }
  0xc2   :  { %780 = vmatprep.subr.mxu0 %v707_v50  ;;  %893 = vmatprep.subr.mxu1 %v709_v51 }
  0xc3   :  { %1317 = vmatmul.mubr.msk.f32.gmra.mxu0 %vm148_vm0, %v1519_v17  ;;  %1325 = vmatmul.mubr.msk.f32.gmra.mxu1 %vm148_vm0, %v1519_v17 }
  0xc4   :  { %781 = vmatpush1.msra.mxu0 %v706_v52  ;;  %894 = vmatpush1.msra.mxu1 %v708_v53 }
  0xc5   :  { %499 = vmatprep.mubr.f32.mxu0 %v1416_v1  ;;  %612 = vmatprep.mubr.f32.mxu1 %v1416_v1 }
  0xc6   :  { %782 = vmatprep.subr.mxu0 %v699_v54  ;;  %895 = vmatprep.subr.mxu1 %v701_v55 }
  0xc7   :  { %1318 = vmatmul.mubr.msk.f32.gmra.mxu0 %vm148_vm0, %v1529_v23  ;;  %1326 = vmatmul.mubr.msk.f32.gmra.mxu1 %vm148_vm0, %v1529_v23 }
  0xc8   :  { %783 = vmatpush1.msra.mxu0 %v698_v57  ;;  %896 = vmatpush1.msra.mxu1 %v700_v58 }
  0xc9   :  { %505 = vmatprep.mubr.f32.mxu0 %v1416_v1  ;;  %618 = vmatprep.mubr.f32.mxu1 %v1416_v1 }
  0xca   :  { %784 = vmatprep.subr.mxu0 %v691_v60  ;;  %897 = vmatprep.subr.mxu1 %v693_v61 }
  0xcb   :  { %1319 = vmatmul.mubr.msk.f32.gmra.mxu0 %vm148_vm0, %v1539_v28  ;;  %1327 = vmatmul.mubr.msk.f32.gmra.mxu1 %vm148_vm0, %v1539_v28 }
  0xcc   :  { %785 = vmatpush1.msra.mxu0 %v690_v62  ;;  %898 = vmatpush1.msra.mxu1 %v692_v63 }
  0xcd   :  { %818 = vmatprep.mubr.f32.mxu0 %v1416_v1  ;;  %931 = vmatprep.mubr.f32.mxu1 %v1416_v1 }
  0xce   :  { %996 = vmatprep.subr.mxu0 %v751_v0  ;;  %1109 = vmatprep.subr.mxu1 %v753_v2 }
  0xcf   :  { %1328 = vmatmul.mubr.msk.f32.vlgmr.msra.gmra.mxu0 %vm148_vm0, %v1469_v49  ;;  %1336 = vmatmul.mubr.msk.f32.vlgmr.msra.gmra.mxu1 %vm148_vm0, %v1469_v49 }
  0xd0   :  { %997 = vmatpush1.msra.mxu0 %v750_v3  ;;  %1110 = vmatpush1.msra.mxu1 %v752_v4 }
  0xd1   :  { %824 = vmatprep.mubr.f32.mxu0 %v1416_v1  ;;  %937 = vmatprep.mubr.f32.mxu1 %v1416_v1 }
  0xd2   :  { %998 = vmatprep.subr.mxu0 %v743_v6  ;;  %1111 = vmatprep.subr.mxu1 %v745_v7 }
  0xd3   :  { %1329 = vmatmul.mubr.msk.f32.gmra.mxu0 %vm148_vm0, %v1480_v56  ;;  %1337 = vmatmul.mubr.msk.f32.gmra.mxu1 %vm148_vm0, %v1480_v56 }
  0xd4   :  { %999 = vmatpush1.msra.mxu0 %v742_v8  ;;  %1112 = vmatpush1.msra.mxu1 %v744_v9 }
  0xd5   :  { %830 = vmatprep.mubr.f32.mxu0 %v1416_v1  ;;  %943 = vmatprep.mubr.f32.mxu1 %v1416_v1 }
  0xd6   :  { %1000 = vmatprep.subr.mxu0 %v735_v10  ;;  %1113 = vmatprep.subr.mxu1 %v737_v12 }
  0xd7   :  { %1330 = vmatmul.mubr.msk.f32.gmra.mxu0 %vm148_vm0, %v1487_v59  ;;  %1338 = vmatmul.mubr.msk.f32.gmra.mxu1 %vm148_vm0, %v1487_v59 }
  0xd8   :  { %1001 = vmatpush1.msra.mxu0 %v734_v13  ;;  %1114 = vmatpush1.msra.mxu1 %v736_v14 }
  0xd9   :  { %836 = vmatprep.mubr.f32.mxu0 %v1416_v1  ;;  %949 = vmatprep.mubr.f32.mxu1 %v1416_v1 }
  0xda   :  { %1002 = vmatprep.subr.mxu0 %v727_v15  ;;  %1115 = vmatprep.subr.mxu1 %v729_v16 }
  0xdb   :  { %1331 = vmatmul.mubr.msk.f32.gmra.mxu0 %vm148_vm0, %v1499_v5  ;;  %1339 = vmatmul.mubr.msk.f32.gmra.mxu1 %vm148_vm0, %v1499_v5 }
  0xdc   :  { %1003 = vmatpush1.msra.mxu0 %v726_v18  ;;  %1116 = vmatpush1.msra.mxu1 %v728_v19 }
  0xdd   :  { %842 = vmatprep.mubr.f32.mxu0 %v1416_v1  ;;  %955 = vmatprep.mubr.f32.mxu1 %v1416_v1 }
  0xde   :  { %1004 = vmatprep.subr.mxu0 %v719_v20  ;;  %1117 = vmatprep.subr.mxu1 %v721_v21 }
  0xdf   :  { %1332 = vmatmul.mubr.msk.f32.gmra.mxu0 %vm148_vm0, %v1509_v11  ;;  %1340 = vmatmul.mubr.msk.f32.gmra.mxu1 %vm148_vm0, %v1509_v11 }
  0xe0   :  { %1005 = vmatpush1.msra.mxu0 %v718_v22  ;;  %1118 = vmatpush1.msra.mxu1 %v720_v24 }
  0xe1   :  { %848 = vmatprep.mubr.f32.mxu0 %v1416_v1  ;;  %961 = vmatprep.mubr.f32.mxu1 %v1416_v1 }
  0xe2   :  { %1006 = vmatprep.subr.mxu0 %v711_v25  ;;  %1119 = vmatprep.subr.mxu1 %v713_v26 }
  0xe3   :  { %1333 = vmatmul.mubr.msk.f32.gmra.mxu0 %vm148_vm0, %v1519_v17  ;;  %1341 = vmatmul.mubr.msk.f32.gmra.mxu1 %vm148_vm0, %v1519_v17 }
  0xe4   :  { %1007 = vmatpush1.msra.mxu0 %v710_v27  ;;  %1120 = vmatpush1.msra.mxu1 %v712_v29 }
  0xe5   :  { %854 = vmatprep.mubr.f32.mxu0 %v1416_v1  ;;  %967 = vmatprep.mubr.f32.mxu1 %v1416_v1 }
  0xe6   :  { %1008 = vmatprep.subr.mxu0 %v703_v30  ;;  %1121 = vmatprep.subr.mxu1 %v705_v31 }
  0xe7   :  { %1334 = vmatmul.mubr.msk.f32.gmra.mxu0 %vm148_vm0, %v1529_v23  ;;  %1342 = vmatmul.mubr.msk.f32.gmra.mxu1 %vm148_vm0, %v1529_v23 }
  0xe8   :  { %1009 = vmatpush1.msra.mxu0 %v702_v32  ;;  %1122 = vmatpush1.msra.mxu1 %v704_v33 }
  0xe9   :  { %860 = vmatprep.mubr.f32.mxu0 %v1416_v1  ;;  %973 = vmatprep.mubr.f32.mxu1 %v1416_v1 }
  0xea   :  { %1010 = vmatprep.subr.mxu0 %v695_v34  ;;  %1123 = vmatprep.subr.mxu1 %v697_v35 }
  0xeb   :  { %1335 = vmatmul.mubr.msk.f32.gmra.mxu0 %vm148_vm0, %v1539_v28  ;;  %1343 = vmatmul.mubr.msk.f32.gmra.mxu1 %vm148_vm0, %v1539_v28 }
  0xec   :  { %1011 = vmatpush1.msra.mxu0 %v694_v36  ;;  %1124 = vmatpush1.msra.mxu1 %v696_v37 }
  0xed   :  { %1044 = vmatprep.mubr.f32.mxu0 %v1416_v1  ;;  %1157 = vmatprep.mubr.f32.mxu1 %v1416_v1 }
  0xef   :  { %1344 = vmatmul.mubr.msk.f32.vlgmr.msra.gmra.mxu0 %vm148_vm0, %v1469_v49  ;;  %1352 = vmatmul.mubr.msk.f32.vlgmr.msra.gmra.mxu1 %vm148_vm0, %v1469_v49 }
  0xf0   :  { %1050 = vmatprep.mubr.f32.mxu0 %v1416_v1  ;;  %1163 = vmatprep.mubr.f32.mxu1 %v1416_v1 }
  0xf3   :  { %1345 = vmatmul.mubr.msk.f32.gmra.mxu0 %vm148_vm0, %v1480_v56  ;;  %1353 = vmatmul.mubr.msk.f32.gmra.mxu1 %vm148_vm0, %v1480_v56 }
  0xf4   :  { %1056 = vmatprep.mubr.f32.mxu0 %v1416_v1  ;;  %1169 = vmatprep.mubr.f32.mxu1 %v1416_v1 }
  0xf7   :  { %1346 = vmatmul.mubr.msk.f32.gmra.mxu0 %vm148_vm0, %v1487_v59  ;;  %1354 = vmatmul.mubr.msk.f32.gmra.mxu1 %vm148_vm0, %v1487_v59 }
  0xf8   :  { %1062 = vmatprep.mubr.f32.mxu0 %v1416_v1  ;;  %1175 = vmatprep.mubr.f32.mxu1 %v1416_v1 }
  0xfb   :  { %1347 = vmatmul.mubr.msk.f32.gmra.mxu0 %vm148_vm0, %v1499_v5  ;;  %1355 = vmatmul.mubr.msk.f32.gmra.mxu1 %vm148_vm0, %v1499_v5 }
  0xfc   :  { %1068 = vmatprep.mubr.f32.mxu0 %v1416_v1  ;;  %1181 = vmatprep.mubr.f32.mxu1 %v1416_v1 }
  0xff   :  { %1348 = vmatmul.mubr.msk.f32.gmra.mxu0 %vm148_vm0, %v1509_v11  ;;  %1356 = vmatmul.mubr.msk.f32.gmra.mxu1 %vm148_vm0, %v1509_v11 }
 0x100   :  { %1074 = vmatprep.mubr.f32.mxu0 %v1416_v1  ;;  %1187 = vmatprep.mubr.f32.mxu1 %v1416_v1 }
 0x103   :  { %1349 = vmatmul.mubr.msk.f32.gmra.mxu0 %vm148_vm0, %v1519_v17  ;;  %1357 = vmatmul.mubr.msk.f32.gmra.mxu1 %vm148_vm0, %v1519_v17 }
 0x104   :  { %1080 = vmatprep.mubr.f32.mxu0 %v1416_v1  ;;  %1193 = vmatprep.mubr.f32.mxu1 %v1416_v1 }
 0x107   :  { %1350 = vmatmul.mubr.msk.f32.gmra.mxu0 %vm148_vm0, %v1529_v23  ;;  %1358 = vmatmul.mubr.msk.f32.gmra.mxu1 %vm148_vm0, %v1529_v23 }
 0x108   :  { %1086 = vmatprep.mubr.f32.mxu0 %v1416_v1  ;;  %1199 = vmatprep.mubr.f32.mxu1 %v1416_v1 }
 0x10b   :  { %1351 = vmatmul.mubr.msk.f32.gmra.mxu0 %vm148_vm0, %v1539_v28  ;;  %1359 = vmatmul.mubr.msk.f32.gmra.mxu1 %vm148_vm0, %v1539_v28 }
 0x14f   :  { %v239_v49 = vpop.f32.mrf.mxu0  ;;  %v352_v56 = vpop.f32.mrf.mxu1 }
 0x150   :  { %625 = vst [vmem:[#allocation5] sm:$0xff] %v239_v49  ;;  %627 = vst [vmem:[#allocation5 + $0x10] sm:$0xff] %v352_v56 }
 0x151   :  { %v241_v59 = vpop.f32.mrf.mxu0  ;;  %v354_v5 = vpop.f32.mrf.mxu1 }
 0x152   :  { %626 = vst [vmem:[#allocation5 + $0x8] sm:$0xff] %v241_v59  ;;  %628 = vst [vmem:[#allocation5 + $0x18] sm:$0xff] %v354_v5 }
 0x153   :  { %v245_v11 = vpop.f32.mrf.mxu0  ;;  %v358_v17 = vpop.f32.mrf.mxu1 }
 0x154   :  { %633 = vst [vmem:[#allocation5 + $0x40] sm:$0xff] %v245_v11  ;;  %635 = vst [vmem:[#allocation5 + $0x50] sm:$0xff] %v358_v17 }
 0x155   :  { %v247_v23 = vpop.f32.mrf.mxu0  ;;  %v360_v1 = vpop.f32.mrf.mxu1 }
 0x156   :  { %634 = vst [vmem:[#allocation5 + $0x48] sm:$0xff] %v247_v23  ;;  %636 = vst [vmem:[#allocation5 + $0x58] sm:$0xff] %v360_v1 }
 0x157   :  { %v251_v38 = vpop.f32.mrf.mxu0  ;;  %v364_v39 = vpop.f32.mrf.mxu1 }
 0x158   :  { %641 = vst [vmem:[#allocation5 + $0x80] sm:$0xff] %v251_v38  ;;  %643 = vst [vmem:[#allocation5 + $0x90] sm:$0xff] %v364_v39 }
 0x159   :  { %v253_v28 = vpop.f32.mrf.mxu0  ;;  %v366_v40 = vpop.f32.mrf.mxu1 }
 0x15a   :  { %642 = vst [vmem:[#allocation5 + $0x88] sm:$0xff] %v253_v28  ;;  %644 = vst [vmem:[#allocation5 + $0x98] sm:$0xff] %v366_v40 }
 0x15b   :  { %v257_v41 = vpop.f32.mrf.mxu0  ;;  %v370_v42 = vpop.f32.mrf.mxu1 }
 0x15c   :  { %649 = vst [vmem:[#allocation5 + $0xc0] sm:$0xff] %v257_v41  ;;  %651 = vst [vmem:[#allocation5 + $0xd0] sm:$0xff] %v370_v42 }
 0x15d   :  { %v259_v43 = vpop.f32.mrf.mxu0  ;;  %v372_v44 = vpop.f32.mrf.mxu1 }
 0x15e   :  { %650 = vst [vmem:[#allocation5 + $0xc8] sm:$0xff] %v259_v43  ;;  %652 = vst [vmem:[#allocation5 + $0xd8] sm:$0xff] %v372_v44 }
 0x15f   :  { %v263_v45 = vpop.f32.mrf.mxu0  ;;  %v376_v46 = vpop.f32.mrf.mxu1 }
 0x160   :  { %657 = vst [vmem:[#allocation5 + $0x100] sm:$0xff] %v263_v45  ;;  %659 = vst [vmem:[#allocation5 + $0x110] sm:$0xff] %v376_v46 }
 0x161   :  { %v265_v47 = vpop.f32.mrf.mxu0  ;;  %v378_v48 = vpop.f32.mrf.mxu1 }
 0x162   :  { %658 = vst [vmem:[#allocation5 + $0x108] sm:$0xff] %v265_v47  ;;  %660 = vst [vmem:[#allocation5 + $0x118] sm:$0xff] %v378_v48 }
 0x163   :  { %v269_v50 = vpop.f32.mrf.mxu0  ;;  %v382_v51 = vpop.f32.mrf.mxu1 }
 0x164   :  { %665 = vst [vmem:[#allocation5 + $0x140] sm:$0xff] %v269_v50  ;;  %667 = vst [vmem:[#allocation5 + $0x150] sm:$0xff] %v382_v51 }
 0x165   :  { %v271_v52 = vpop.f32.mrf.mxu0  ;;  %v384_v53 = vpop.f32.mrf.mxu1 }
 0x166   :  { %666 = vst [vmem:[#allocation5 + $0x148] sm:$0xff] %v271_v52  ;;  %668 = vst [vmem:[#allocation5 + $0x158] sm:$0xff] %v384_v53 }
 0x167   :  { %v275_v54 = vpop.f32.mrf.mxu0  ;;  %v388_v55 = vpop.f32.mrf.mxu1 }
 0x168   :  { %673 = vst [vmem:[#allocation5 + $0x180] sm:$0xff] %v275_v54  ;;  %675 = vst [vmem:[#allocation5 + $0x190] sm:$0xff] %v388_v55 }
 0x169   :  { %v277_v57 = vpop.f32.mrf.mxu0  ;;  %v390_v58 = vpop.f32.mrf.mxu1 }
 0x16a   :  { %674 = vst [vmem:[#allocation5 + $0x188] sm:$0xff] %v277_v57  ;;  %676 = vst [vmem:[#allocation5 + $0x198] sm:$0xff] %v390_v58 }
 0x16b   :  { %v281_v60 = vpop.f32.mrf.mxu0  ;;  %v394_v61 = vpop.f32.mrf.mxu1 }
 0x16c   :  { %681 = vst [vmem:[#allocation5 + $0x1c0] sm:$0xff] %v281_v60  ;;  %683 = vst [vmem:[#allocation5 + $0x1d0] sm:$0xff] %v394_v61 }
 0x16d   :  { %v283_v62 = vpop.f32.mrf.mxu0  ;;  %v396_v63 = vpop.f32.mrf.mxu1 }
 0x16e   :  { %682 = vst [vmem:[#allocation5 + $0x1c8] sm:$0xff] %v283_v62  ;;  %684 = vst [vmem:[#allocation5 + $0x1d8] sm:$0xff] %v396_v63 }
 0x16f   :  { %v465_v0 = vpop.f32.mrf.mxu0  ;;  %v578_v2 = vpop.f32.mrf.mxu1 }
 0x170   :  { %629 = vst [vmem:[#allocation5 + $0x20] sm:$0xff] %v465_v0  ;;  %631 = vst [vmem:[#allocation5 + $0x30] sm:$0xff] %v578_v2 }
 0x171   :  { %v467_v3 = vpop.f32.mrf.mxu0  ;;  %v580_v4 = vpop.f32.mrf.mxu1 }
 0x172   :  { %630 = vst [vmem:[#allocation5 + $0x28] sm:$0xff] %v467_v3  ;;  %632 = vst [vmem:[#allocation5 + $0x38] sm:$0xff] %v580_v4 }
 0x173   :  { %v471_v6 = vpop.f32.mrf.mxu0  ;;  %v584_v7 = vpop.f32.mrf.mxu1 }
 0x174   :  { %637 = vst [vmem:[#allocation5 + $0x60] sm:$0xff] %v471_v6  ;;  %639 = vst [vmem:[#allocation5 + $0x70] sm:$0xff] %v584_v7 }
 0x175   :  { %v473_v8 = vpop.f32.mrf.mxu0  ;;  %v586_v9 = vpop.f32.mrf.mxu1 }
 0x176   :  { %638 = vst [vmem:[#allocation5 + $0x68] sm:$0xff] %v473_v8  ;;  %640 = vst [vmem:[#allocation5 + $0x78] sm:$0xff] %v586_v9 }
 0x177   :  { %v477_v10 = vpop.f32.mrf.mxu0  ;;  %v590_v12 = vpop.f32.mrf.mxu1 }
 0x178   :  { %645 = vst [vmem:[#allocation5 + $0xa0] sm:$0xff] %v477_v10  ;;  %647 = vst [vmem:[#allocation5 + $0xb0] sm:$0xff] %v590_v12 }
 0x179   :  { %v479_v13 = vpop.f32.mrf.mxu0  ;;  %v592_v14 = vpop.f32.mrf.mxu1 }
 0x17a   :  { %646 = vst [vmem:[#allocation5 + $0xa8] sm:$0xff] %v479_v13  ;;  %648 = vst [vmem:[#allocation5 + $0xb8] sm:$0xff] %v592_v14 }
 0x17b   :  { %v483_v15 = vpop.f32.mrf.mxu0  ;;  %v596_v16 = vpop.f32.mrf.mxu1 }
 0x17c   :  { %653 = vst [vmem:[#allocation5 + $0xe0] sm:$0xff] %v483_v15  ;;  %655 = vst [vmem:[#allocation5 + $0xf0] sm:$0xff] %v596_v16 }
 0x17d   :  { %v485_v18 = vpop.f32.mrf.mxu0  ;;  %v598_v19 = vpop.f32.mrf.mxu1 }
 0x17e   :  { %654 = vst [vmem:[#allocation5 + $0xe8] sm:$0xff] %v485_v18  ;;  %656 = vst [vmem:[#allocation5 + $0xf8] sm:$0xff] %v598_v19 }
 0x17f   :  { %v489_v20 = vpop.f32.mrf.mxu0  ;;  %v602_v21 = vpop.f32.mrf.mxu1 }
 0x180   :  { %661 = vst [vmem:[#allocation5 + $0x120] sm:$0xff] %v489_v20  ;;  %663 = vst [vmem:[#allocation5 + $0x130] sm:$0xff] %v602_v21 }
 0x181   :  { %v491_v22 = vpop.f32.mrf.mxu0  ;;  %v604_v24 = vpop.f32.mrf.mxu1 }
 0x182   :  { %662 = vst [vmem:[#allocation5 + $0x128] sm:$0xff] %v491_v22  ;;  %664 = vst [vmem:[#allocation5 + $0x138] sm:$0xff] %v604_v24 }
 0x183   :  { %v495_v25 = vpop.f32.mrf.mxu0  ;;  %v608_v26 = vpop.f32.mrf.mxu1 }
 0x184   :  { %669 = vst [vmem:[#allocation5 + $0x160] sm:$0xff] %v495_v25  ;;  %671 = vst [vmem:[#allocation5 + $0x170] sm:$0xff] %v608_v26 }
 0x185   :  { %v497_v27 = vpop.f32.mrf.mxu0  ;;  %v610_v29 = vpop.f32.mrf.mxu1 }
 0x186   :  { %670 = vst [vmem:[#allocation5 + $0x168] sm:$0xff] %v497_v27  ;;  %672 = vst [vmem:[#allocation5 + $0x178] sm:$0xff] %v610_v29 }
 0x187   :  { %v501_v30 = vpop.f32.mrf.mxu0  ;;  %v614_v31 = vpop.f32.mrf.mxu1 }
 0x188   :  { %677 = vst [vmem:[#allocation5 + $0x1a0] sm:$0xff] %v501_v30  ;;  %679 = vst [vmem:[#allocation5 + $0x1b0] sm:$0xff] %v614_v31 }
 0x189   :  { %v503_v32 = vpop.f32.mrf.mxu0  ;;  %v616_v33 = vpop.f32.mrf.mxu1 }
 0x18a   :  { %678 = vst [vmem:[#allocation5 + $0x1a8] sm:$0xff] %v503_v32  ;;  %680 = vst [vmem:[#allocation5 + $0x1b8] sm:$0xff] %v616_v33 }
 0x18b   :  { %v507_v34 = vpop.f32.mrf.mxu0  ;;  %v620_v35 = vpop.f32.mrf.mxu1 }
 0x18c   :  { %685 = vst [vmem:[#allocation5 + $0x1e0] sm:$0xff] %v507_v34  ;;  %687 = vst [vmem:[#allocation5 + $0x1f0] sm:$0xff] %v620_v35 }
 0x18d   :  { %v509_v36 = vpop.f32.mrf.mxu0  ;;  %v622_v37 = vpop.f32.mrf.mxu1 }
 0x18e   :  { %686 = vst [vmem:[#allocation5 + $0x1e8] sm:$0xff] %v509_v36  ;;  %688 = vst [vmem:[#allocation5 + $0x1f8] sm:$0xff] %v622_v37 }
 0x18f   :  { %v820_v49 = vpop.f32.mrf.mxu0  ;;  %v933_v56 = vpop.f32.mrf.mxu1 }
 0x190   :  { %1207 = vst [vmem:[#allocation5 + $0x200] sm:$0xff] %v820_v49  ;;  %1209 = vst [vmem:[#allocation5 + $0x210] sm:$0xff] %v933_v56 }
 0x191   :  { %v822_v59 = vpop.f32.mrf.mxu0  ;;  %v935_v5 = vpop.f32.mrf.mxu1 }
 0x192   :  { %1208 = vst [vmem:[#allocation5 + $0x208] sm:$0xff] %v822_v59  ;;  %1210 = vst [vmem:[#allocation5 + $0x218] sm:$0xff] %v935_v5 }
 0x193   :  { %v826_v11 = vpop.f32.mrf.mxu0  ;;  %v939_v17 = vpop.f32.mrf.mxu1 }
 0x194   :  { %1215 = vst [vmem:[#allocation5 + $0x240] sm:$0xff] %v826_v11  ;;  %1217 = vst [vmem:[#allocation5 + $0x250] sm:$0xff] %v939_v17 }
 0x195   :  { %v828_v23 = vpop.f32.mrf.mxu0  ;;  %v941_v1 = vpop.f32.mrf.mxu1 }
 0x196   :  { %1216 = vst [vmem:[#allocation5 + $0x248] sm:$0xff] %v828_v23  ;;  %1218 = vst [vmem:[#allocation5 + $0x258] sm:$0xff] %v941_v1 }
 0x197   :  { %v832_v38 = vpop.f32.mrf.mxu0  ;;  %v945_v39 = vpop.f32.mrf.mxu1 }
 0x198   :  { %1223 = vst [vmem:[#allocation5 + $0x280] sm:$0xff] %v832_v38  ;;  %1225 = vst [vmem:[#allocation5 + $0x290] sm:$0xff] %v945_v39 }
 0x199   :  { %v834_v28 = vpop.f32.mrf.mxu0  ;;  %v947_v40 = vpop.f32.mrf.mxu1 }
 0x19a   :  { %1224 = vst [vmem:[#allocation5 + $0x288] sm:$0xff] %v834_v28  ;;  %1226 = vst [vmem:[#allocation5 + $0x298] sm:$0xff] %v947_v40 }
 0x19b   :  { %v838_v41 = vpop.f32.mrf.mxu0  ;;  %v951_v42 = vpop.f32.mrf.mxu1 }
 0x19c   :  { %1231 = vst [vmem:[#allocation5 + $0x2c0] sm:$0xff] %v838_v41  ;;  %1233 = vst [vmem:[#allocation5 + $0x2d0] sm:$0xff] %v951_v42 }
 0x19d   :  { %v840_v43 = vpop.f32.mrf.mxu0  ;;  %v953_v44 = vpop.f32.mrf.mxu1 }
 0x19e   :  { %1232 = vst [vmem:[#allocation5 + $0x2c8] sm:$0xff] %v840_v43  ;;  %1234 = vst [vmem:[#allocation5 + $0x2d8] sm:$0xff] %v953_v44 }
 0x19f   :  { %v844_v45 = vpop.f32.mrf.mxu0  ;;  %v957_v46 = vpop.f32.mrf.mxu1 }
 0x1a0   :  { %1239 = vst [vmem:[#allocation5 + $0x300] sm:$0xff] %v844_v45  ;;  %1241 = vst [vmem:[#allocation5 + $0x310] sm:$0xff] %v957_v46 }
 0x1a1   :  { %v846_v47 = vpop.f32.mrf.mxu0  ;;  %v959_v48 = vpop.f32.mrf.mxu1 }
 0x1a2   :  { %1240 = vst [vmem:[#allocation5 + $0x308] sm:$0xff] %v846_v47  ;;  %1242 = vst [vmem:[#allocation5 + $0x318] sm:$0xff] %v959_v48 }
 0x1a3   :  { %v850_v50 = vpop.f32.mrf.mxu0  ;;  %v963_v51 = vpop.f32.mrf.mxu1 }
 0x1a4   :  { %1247 = vst [vmem:[#allocation5 + $0x340] sm:$0xff] %v850_v50  ;;  %1249 = vst [vmem:[#allocation5 + $0x350] sm:$0xff] %v963_v51 }
 0x1a5   :  { %v852_v52 = vpop.f32.mrf.mxu0  ;;  %v965_v53 = vpop.f32.mrf.mxu1 }
 0x1a6   :  { %1248 = vst [vmem:[#allocation5 + $0x348] sm:$0xff] %v852_v52  ;;  %1250 = vst [vmem:[#allocation5 + $0x358] sm:$0xff] %v965_v53 }
 0x1a7   :  { %v856_v54 = vpop.f32.mrf.mxu0  ;;  %v969_v55 = vpop.f32.mrf.mxu1 }
 0x1a8   :  { %1255 = vst [vmem:[#allocation5 + $0x380] sm:$0xff] %v856_v54  ;;  %1257 = vst [vmem:[#allocation5 + $0x390] sm:$0xff] %v969_v55 }
 0x1a9   :  { %v858_v57 = vpop.f32.mrf.mxu0  ;;  %v971_v58 = vpop.f32.mrf.mxu1 }
 0x1aa   :  { %1256 = vst [vmem:[#allocation5 + $0x388] sm:$0xff] %v858_v57  ;;  %1258 = vst [vmem:[#allocation5 + $0x398] sm:$0xff] %v971_v58 }
 0x1ab   :  { %v862_v60 = vpop.f32.mrf.mxu0  ;;  %v975_v61 = vpop.f32.mrf.mxu1 }
 0x1ac   :  { %1263 = vst [vmem:[#allocation5 + $0x3c0] sm:$0xff] %v862_v60  ;;  %1265 = vst [vmem:[#allocation5 + $0x3d0] sm:$0xff] %v975_v61 }
 0x1ad   :  { %v864_v62 = vpop.f32.mrf.mxu0  ;;  %v977_v63 = vpop.f32.mrf.mxu1 }
 0x1ae   :  { %1264 = vst [vmem:[#allocation5 + $0x3c8] sm:$0xff] %v864_v62  ;;  %1266 = vst [vmem:[#allocation5 + $0x3d8] sm:$0xff] %v977_v63 }
 0x1af   :  { %v1046_v0 = vpop.f32.mrf.mxu0  ;;  %v1159_v2 = vpop.f32.mrf.mxu1 }
 0x1b0   :  { %1211 = vst [vmem:[#allocation5 + $0x220] sm:$0xff] %v1046_v0  ;;  %1213 = vst [vmem:[#allocation5 + $0x230] sm:$0xff] %v1159_v2 }
 0x1b1   :  { %v1048_v3 = vpop.f32.mrf.mxu0  ;;  %v1161_v4 = vpop.f32.mrf.mxu1 }
 0x1b2   :  { %1212 = vst [vmem:[#allocation5 + $0x228] sm:$0xff] %v1048_v3  ;;  %1214 = vst [vmem:[#allocation5 + $0x238] sm:$0xff] %v1161_v4 }
 0x1b3   :  { %v1052_v6 = vpop.f32.mrf.mxu0  ;;  %v1165_v7 = vpop.f32.mrf.mxu1 }
 0x1b4   :  { %1219 = vst [vmem:[#allocation5 + $0x260] sm:$0xff] %v1052_v6  ;;  %1221 = vst [vmem:[#allocation5 + $0x270] sm:$0xff] %v1165_v7 }
 0x1b5   :  { %v1054_v8 = vpop.f32.mrf.mxu0  ;;  %v1167_v9 = vpop.f32.mrf.mxu1 }
 0x1b6   :  { %1220 = vst [vmem:[#allocation5 + $0x268] sm:$0xff] %v1054_v8  ;;  %1222 = vst [vmem:[#allocation5 + $0x278] sm:$0xff] %v1167_v9 }
 0x1b7   :  { %v1058_v10 = vpop.f32.mrf.mxu0  ;;  %v1171_v12 = vpop.f32.mrf.mxu1 }
 0x1b8   :  { %1227 = vst [vmem:[#allocation5 + $0x2a0] sm:$0xff] %v1058_v10  ;;  %1229 = vst [vmem:[#allocation5 + $0x2b0] sm:$0xff] %v1171_v12 }
 0x1b9   :  { %v1060_v13 = vpop.f32.mrf.mxu0  ;;  %v1173_v14 = vpop.f32.mrf.mxu1 }
 0x1ba   :  { %1228 = vst [vmem:[#allocation5 + $0x2a8] sm:$0xff] %v1060_v13  ;;  %1230 = vst [vmem:[#allocation5 + $0x2b8] sm:$0xff] %v1173_v14 }
 0x1bb   :  { %v1064_v15 = vpop.f32.mrf.mxu0  ;;  %v1177_v16 = vpop.f32.mrf.mxu1 }
 0x1bc   :  { %1235 = vst [vmem:[#allocation5 + $0x2e0] sm:$0xff] %v1064_v15  ;;  %1237 = vst [vmem:[#allocation5 + $0x2f0] sm:$0xff] %v1177_v16 }
 0x1bd   :  { %v1066_v18 = vpop.f32.mrf.mxu0  ;;  %v1179_v19 = vpop.f32.mrf.mxu1 }
 0x1be   :  { %1236 = vst [vmem:[#allocation5 + $0x2e8] sm:$0xff] %v1066_v18  ;;  %1238 = vst [vmem:[#allocation5 + $0x2f8] sm:$0xff] %v1179_v19 }
 0x1bf   :  { %v1070_v20 = vpop.f32.mrf.mxu0  ;;  %v1183_v21 = vpop.f32.mrf.mxu1 }
 0x1c0   :  { %1243 = vst [vmem:[#allocation5 + $0x320] sm:$0xff] %v1070_v20  ;;  %1245 = vst [vmem:[#allocation5 + $0x330] sm:$0xff] %v1183_v21 }
 0x1c1   :  { %v1072_v22 = vpop.f32.mrf.mxu0  ;;  %v1185_v24 = vpop.f32.mrf.mxu1 }
 0x1c2   :  { %1244 = vst [vmem:[#allocation5 + $0x328] sm:$0xff] %v1072_v22  ;;  %1246 = vst [vmem:[#allocation5 + $0x338] sm:$0xff] %v1185_v24 }
 0x1c3   :  { %v1076_v25 = vpop.f32.mrf.mxu0  ;;  %v1189_v26 = vpop.f32.mrf.mxu1 }
 0x1c4   :  { %1251 = vst [vmem:[#allocation5 + $0x360] sm:$0xff] %v1076_v25  ;;  %1253 = vst [vmem:[#allocation5 + $0x370] sm:$0xff] %v1189_v26 }
 0x1c5   :  { %v1078_v27 = vpop.f32.mrf.mxu0  ;;  %v1191_v29 = vpop.f32.mrf.mxu1 }
 0x1c6   :  { %1252 = vst [vmem:[#allocation5 + $0x368] sm:$0xff] %v1078_v27  ;;  %1254 = vst [vmem:[#allocation5 + $0x378] sm:$0xff] %v1191_v29 }
 0x1c7   :  { %v1082_v30 = vpop.f32.mrf.mxu0  ;;  %v1195_v31 = vpop.f32.mrf.mxu1 }
 0x1c8   :  { %1259 = vst [vmem:[#allocation5 + $0x3a0] sm:$0xff] %v1082_v30  ;;  %1261 = vst [vmem:[#allocation5 + $0x3b0] sm:$0xff] %v1195_v31 }
 0x1c9   :  { %v1084_v32 = vpop.f32.mrf.mxu0  ;;  %v1197_v33 = vpop.f32.mrf.mxu1 }
 0x1ca   :  { %1260 = vst [vmem:[#allocation5 + $0x3a8] sm:$0xff] %v1084_v32  ;;  %1262 = vst [vmem:[#allocation5 + $0x3b8] sm:$0xff] %v1197_v33 }
 0x1cb   :  { %v1088_v34 = vpop.f32.mrf.mxu0  ;;  %v1201_v35 = vpop.f32.mrf.mxu1 }
 0x1cc   :  { %1267 = vst [vmem:[#allocation5 + $0x3e0] sm:$0xff] %v1088_v34  ;;  %1269 = vst [vmem:[#allocation5 + $0x3f0] sm:$0xff] %v1201_v35 }
 0x1cd   :  { %v1090_v36 = vpop.f32.mrf.mxu0  ;;  %v1203_v37 = vpop.f32.mrf.mxu1 }
 0x1ce   :  { %1268 = vst [vmem:[#allocation5 + $0x3e8] sm:$0xff] %v1090_v36  ;;  %1270 = vst [vmem:[#allocation5 + $0x3f8] sm:$0xff] %v1203_v37 }
 0x1cf   :  { %1399 = shalt.err (!%p1396_p9)
}
 0x1d0   :  { %1282 = dma.vmem_to_hbm [thread:$0]  %s1277_s3, 16384, %s1697_s2, [#allocation4], %s1413_s12, %s1413_s12, %s1414_s13  }
 0x1d1   :  { %1410 = dma.done.wait [#allocation4], 16384  }
 0x1d2   :  { %1411 = vsyncadd [#allocation4], 4294950912 }
 0x1d3   :  { %1286 = vsyncpa [#allocation3], 1 }
 0x1d4   :  { %1287 = vsyncpa [#allocation4], 1 }

</bundles_post_ra>
